<compile_context>
chip_gen: v5e
topology: v5e:2x2
jax: 0.10.0
libtpu: 0.0.40
codegen_flags: <defaults>
</compile_context>

<pallas_src>
import numpy as np
import jax
import jax.numpy as jnp
from jax.experimental import pallas as pl
from jax.experimental.pallas import tpu as pltpu


_GELU_C = 0.7978845608028654  # sqrt(2 / pi)


def _mlp_kernel(x_ref, w1_ref, b1_ref, w2_ref, b2_ref, o_ref):
    # x_ref: (TM, D_in) token tile; weights / biases are whole-array blocks.
    x = x_ref[...].astype(jnp.float32)                      # in-kernel cast

    # fc1: (TM, D_in) @ (D_in, H) + b1   — MXU matmul, f32 accumulation.
    h = jnp.dot(x, w1_ref[...].astype(jnp.float32),
                preferred_element_type=jnp.float32) + b1_ref[...].astype(jnp.float32)

    # GELU (tanh approximation) — transcendentals go to the EUP slot.
    h = 0.5 * h * (1.0 + jnp.tanh(_GELU_C * (h + 0.044715 * h * h * h)))

    # Dropout is identity in eval mode.
    # TODO(synk): training-mode dropout would use pltpu.prng_seed + pltpu.prng_random_bits.

    # fc2: (TM, H) @ (H, D_out) + b2
    o = jnp.dot(h, w2_ref[...].astype(jnp.float32),
                preferred_element_type=jnp.float32) + b2_ref[...].astype(jnp.float32)

    o_ref[...] = o.astype(o_ref.dtype)


def mlp_forward(x, w1, b1, w2, b2, *, block_m=8):
    """Fused MLP forward.

    x : (..., in_features)
    w1: (in_features, hidden_features)   (i.e. torch fc1.weight.T)
    b1: (hidden_features,)
    w2: (hidden_features, out_features)  (i.e. torch fc2.weight.T)
    b2: (out_features,)
    """
    *lead, d_in = x.shape
    m = int(np.prod(lead)) if lead else 1
    d_hidden = w1.shape[1]
    d_out = w2.shape[1]

    xf = x.reshape(m, d_in)
    n_blocks = pl.cdiv(m, block_m)
    m_pad = n_blocks * block_m
    if m_pad != m:
        xf = jnp.pad(xf, ((0, m_pad - m), (0, 0)))

    b1_2d = b1.reshape(1, d_hidden)
    b2_2d = b2.reshape(1, d_out)

    out = pl.pallas_call(
        _mlp_kernel,
        out_shape=jax.ShapeDtypeStruct((m_pad, d_out), jnp.float32),
        grid=(n_blocks,),
        in_specs=[
            pl.BlockSpec((block_m, d_in), lambda i: (i, 0)),       # token tile
            pl.BlockSpec((d_in, d_hidden), lambda i: (0, 0)),      # W1 (constant)
            pl.BlockSpec((1, d_hidden), lambda i: (0, 0)),         # b1 (constant)
            pl.BlockSpec((d_hidden, d_out), lambda i: (0, 0)),     # W2 (constant)
            pl.BlockSpec((1, d_out), lambda i: (0, 0)),            # b2 (constant)
        ],
        out_specs=pl.BlockSpec((block_m, d_out), lambda i: (i, 0)),
        compiler_params=pltpu.CompilerParams(
            dimension_semantics=("parallel",)),
    )(xf, w1, b1_2d, w2, b2_2d)

    out = out[:m].astype(x.dtype)
    return out.reshape(*lead, d_out)


def _ref_mlp(x, w1, b1, w2, b2):
    """Pure-numpy f32 reference (eval-mode dropout = identity, tanh GELU)."""
    xn = np.asarray(x, dtype=np.float32).reshape(-1, x.shape[-1])
    h = xn @ np.asarray(w1, dtype=np.float32) + np.asarray(b1, dtype=np.float32)
    h = 0.5 * h * (1.0 + np.tanh(_GELU_C * (h + 0.044715 * h ** 3)))
    o = h @ np.asarray(w2, dtype=np.float32) + np.asarray(b2, dtype=np.float32)
    return o.reshape(x.shape[:-1] + (w2.shape[1],))


if __name__ == "__main__":
    key = jax.random.PRNGKey(0)
    B, N, D_IN, D_HIDDEN, D_OUT = 2, 8, 32, 64, 32

    k1, k2, k3, k4, k5 = jax.random.split(key, 5)
    x = jax.random.normal(k1, (B, N, D_IN), dtype=jnp.float32)
    # Stored pre-transposed relative to torch.nn.Linear.weight ((out, in)).
    w1 = 0.1 * jax.random.normal(k2, (D_IN, D_HIDDEN), dtype=jnp.float32)
    b1 = 0.1 * jax.random.normal(k3, (D_HIDDEN,), dtype=jnp.float32)
    w2 = 0.1 * jax.random.normal(k4, (D_HIDDEN, D_OUT), dtype=jnp.float32)
    b2 = 0.1 * jax.random.normal(k5, (D_OUT,), dtype=jnp.float32)

    y = mlp_forward(x, w1, b1, w2, b2, block_m=8)
    y = jax.block_until_ready(y)

    y_ref = _ref_mlp(x, w1, b1, w2, b2)
    np.testing.assert_allclose(np.asarray(y), y_ref, rtol=2e-2, atol=2e-2)

    print("KERNEL_OK")
</pallas_src>

<mosaic_0001>
module attributes {stable_mosaic.version = 11 : i64} {
  func.func @_mlp_kernel(%arg0: i32, %arg1: memref<8x32xf32, #tpu.memory_space<vmem>>, %arg2: memref<32x64xf32, #tpu.memory_space<vmem>>, %arg3: memref<1x64xf32, #tpu.memory_space<vmem>>, %arg4: memref<64x32xf32, #tpu.memory_space<vmem>>, %arg5: memref<1x32xf32, #tpu.memory_space<vmem>>, %arg6: memref<8x32xf32, #tpu.memory_space<vmem>>) attributes {dimension_semantics = [#tpu.dimension_semantics<parallel>], iteration_bounds = array<i64: 2>, scalar_prefetch = 0 : i64, scratch_operands = 0 : i64, tpu.core_type = #tpu.core_type<tc>, window_params = [{transform_indices = @transform_0, window_bounds = array<i64: 8, 32>}, {pipeline_mode = #tpu.pipeline_mode<synchronous>, transform_indices = @transform_1, window_bounds = array<i64: 32, 64>}, {pipeline_mode = #tpu.pipeline_mode<synchronous>, transform_indices = @transform_2, window_bounds = array<i64: 1, 64>}, {pipeline_mode = #tpu.pipeline_mode<synchronous>, transform_indices = @transform_3, window_bounds = array<i64: 64, 32>}, {pipeline_mode = #tpu.pipeline_mode<synchronous>, transform_indices = @transform_4, window_bounds = array<i64: 1, 32>}, {transform_indices = @transform_5, window_bounds = array<i64: 8, 32>}]} {
    %c0 = arith.constant 0 : index
    %c0_0 = arith.constant 0 : index
    %0 = vector.load %arg1[%c0, %c0_0] : memref<8x32xf32, #tpu.memory_space<vmem>>, vector<8x32xf32>
    %c0_1 = arith.constant 0 : index
    %c0_2 = arith.constant 0 : index
    %1 = vector.load %arg2[%c0_1, %c0_2] : memref<32x64xf32, #tpu.memory_space<vmem>>, vector<32x64xf32>
    %cst = arith.constant dense<0.000000e+00> : vector<8x64xf32>
    %2 = tpu.matmul %0, %1, %cst {dimension_numbers = #tpu.dot_dimension_numbers<[1], [0], [0], [1], [0, 0, 1, 1], [], []>} : vector<8x32xf32>, vector<32x64xf32>, vector<8x64xf32> -> vector<8x64xf32>
    %c0_3 = arith.constant 0 : index
    %c0_4 = arith.constant 0 : index
    %3 = vector.load %arg3[%c0_3, %c0_4] : memref<1x64xf32, #tpu.memory_space<vmem>>, vector<1x64xf32>
    %4 = vector.broadcast %3 : vector<1x64xf32> to vector<8x64xf32>
    %5 = arith.addf %2, %4 : vector<8x64xf32>
    %cst_5 = arith.constant 5.000000e-01 : f32
    %6 = vector.broadcast %cst_5 : f32 to vector<8x64xf32>
    %7 = arith.mulf %6, %5 : vector<8x64xf32>
    %cst_6 = arith.constant 4.471500e-02 : f32
    %8 = vector.broadcast %cst_6 : f32 to vector<8x64xf32>
    %9 = arith.mulf %8, %5 : vector<8x64xf32>
    %10 = arith.mulf %9, %5 : vector<8x64xf32>
    %11 = arith.mulf %10, %5 : vector<8x64xf32>
    %12 = arith.addf %5, %11 : vector<8x64xf32>
    %cst_7 = arith.constant 0.797884583 : f32
    %13 = vector.broadcast %cst_7 : f32 to vector<8x64xf32>
    %14 = arith.mulf %13, %12 : vector<8x64xf32>
    %15 = math.tanh %14 : vector<8x64xf32>
    %cst_8 = arith.constant 1.000000e+00 : f32
    %16 = vector.broadcast %cst_8 : f32 to vector<8x64xf32>
    %17 = arith.addf %16, %15 : vector<8x64xf32>
    %18 = arith.mulf %7, %17 : vector<8x64xf32>
    %c0_9 = arith.constant 0 : index
    %c0_10 = arith.constant 0 : index
    %19 = vector.load %arg4[%c0_9, %c0_10] : memref<64x32xf32, #tpu.memory_space<vmem>>, vector<64x32xf32>
    %cst_11 = arith.constant dense<0.000000e+00> : vector<8x32xf32>
    %20 = tpu.matmul %18, %19, %cst_11 {dimension_numbers = #tpu.dot_dimension_numbers<[1], [0], [0], [1], [0, 0, 1, 1], [], []>} : vector<8x64xf32>, vector<64x32xf32>, vector<8x32xf32> -> vector<8x32xf32>
    %c0_12 = arith.constant 0 : index
    %c0_13 = arith.constant 0 : index
    %21 = vector.load %arg5[%c0_12, %c0_13] : memref<1x32xf32, #tpu.memory_space<vmem>>, vector<1x32xf32>
    %22 = vector.broadcast %21 : vector<1x32xf32> to vector<8x32xf32>
    %23 = arith.addf %20, %22 : vector<8x32xf32>
    %c0_14 = arith.constant 0 : index
    %c0_15 = arith.constant 0 : index
    %24 = vector.load %arg6[%c0_14, %c0_15] : memref<8x32xf32, #tpu.memory_space<vmem>>, vector<8x32xf32>
    tpu.vector_store %arg6[%c0_14, %c0_15], %23 {strides = array<i32>} : memref<8x32xf32, #tpu.memory_space<vmem>>, vector<8x32xf32>,
    return
  }
  func.func @transform_0(%arg0: i32) -> (i32, i32) {
    %c0_i32 = arith.constant 0 : i32
    %c0_i32_0 = arith.constant 0 : i32
    return %arg0, %c0_i32 : i32, i32
  }
  func.func @transform_1(%arg0: i32) -> (i32, i32) {
    %c0_i32 = arith.constant 0 : i32
    %c0_i32_0 = arith.constant 0 : i32
    %c0_i32_1 = arith.constant 0 : i32
    return %c0_i32, %c0_i32_0 : i32, i32
  }
  func.func @transform_2(%arg0: i32) -> (i32, i32) {
    %c0_i32 = arith.constant 0 : i32
    %c0_i32_0 = arith.constant 0 : i32
    %c0_i32_1 = arith.constant 0 : i32
    return %c0_i32, %c0_i32_0 : i32, i32
  }
  func.func @transform_3(%arg0: i32) -> (i32, i32) {
    %c0_i32 = arith.constant 0 : i32
    %c0_i32_0 = arith.constant 0 : i32
    %c0_i32_1 = arith.constant 0 : i32
    return %c0_i32, %c0_i32_0 : i32, i32
  }
  func.func @transform_4(%arg0: i32) -> (i32, i32) {
    %c0_i32 = arith.constant 0 : i32
    %c0_i32_0 = arith.constant 0 : i32
    %c0_i32_1 = arith.constant 0 : i32
    return %c0_i32, %c0_i32_0 : i32, i32
  }
  func.func @transform_5(%arg0: i32) -> (i32, i32) {
    %c0_i32 = arith.constant 0 : i32
    %c0_i32_0 = arith.constant 0 : i32
    return %arg0, %c0_i32 : i32, i32
  }
}

</mosaic_0001>

<bundles_post_ra>
// kernel: tpu_custom_call.1
= control target key start
LH: loop header
LB: loop body
LE: loop exit
PB: predicated region body
PF: predicated region fallthrough
CT: control target
= control target key end

     0   :  { %10 = vsyncpa [#allocation3], 0  ;;  %s652_s0 = inlined_call_operand.vmem [shape: f32[16,32], index: 0, kind: input, shape index: {}]   ;;  %s653_s1 = inlined_call_operand.vmem [shape: f32[32,64], index: 1, kind: input, shape index: {}]   ;;  %s654_s2 = inlined_call_operand.vmem [shape: f32[1,64], index: 2, kind: input, shape index: {}]   ;;  %s655_s3 = inlined_call_operand.vmem [shape: f32[64,32], index: 3, kind: input, shape index: {}]   ;;  %s656_s4 = inlined_call_operand.vmem [shape: f32[1,32], index: 4, kind: input, shape index: {}]   ;;  %s657_s5 = inlined_call_operand.hbm [shape: f32[16,32], index: 5, kind: output, shape index: {}]  }
   0x1   :  { %12 = vsyncpa [#allocation3 + $0x1], 0  ;;  %s523_s18 = smov 0   ;;  %s525_s19 = smov 0  }
   0x2   :  { %s527_s20 = smov 0   ;;  %s529_s21 = smov 0  }
   0x3 LB: > { %s544_s22 = sadd.s32 4294967295, %s491_s21   ;;  %s374_s23 = sadd.s32 4294967294, %s491_s21   ;;  %s491_s21 = sphi %s529_s21, %s663_s21   ;;  %s487_s20 = sphi %s527_s20, %s662_s20   ;;  %s483_s19 = sphi %s525_s19, %s661_s19   ;;  %s479_s18 = sphi %s523_s18, %s660_s18  }
   0x4   : > { %s548_s24 = sadd.s32 1, %s491_s21   ;;  %s135_s25 = sadd.s32 1, %s487_s20 }
   0x5   : > { %s132_s26 = ssub.s32 %s491_s21, %s548_s24  ;;  %p145_p0 = scmp.ne.s32.totalorder %s487_s20, %s483_s19 }
   0x6   : > { %p133_p1 = scmp.eq.s32.totalorder %s132_s26, 0  ;;  %p146_p2 = scmp.eq.s32.totalorder %s544_s22, 1 }
   0x7   : > { %p151_p3 = scmp.ne.s32.totalorder %s483_s19, %s479_s18  ;;  %p152_p4 = scmp.eq.s32.totalorder %s374_s23, 1 }
   0x8   : > { %s559_s27 = scalar_select %p133_p1, %s487_s20, %s135_s25  }
   0x9   : > { %p561_p5 = por %p146_p2, %p145_p0  ;;  %p565_p6 = por %p152_p4, %p151_p3 }
   0xa   : > { %p377_p7 = scmp.ge.s32.totalorder %s491_s21, 1  ;;  %p189_p8 = scmp.lt.s32.totalorder %s491_s21, 3 }
   0xc   : > { %p190_p9 = pnand %p377_p7, %p189_p8 }
   0xd   : > { %p216_p10 = scmp.lt.s32.totalorder (!%p190_p9), %s544_s22, 1  ;;  %s213_s26 = sand.u32 (!%p190_p9), 1, %s483_s19  }
   0xe   : > { %193 = sbr.rel (%p190_p9) target bundleno = 307 (0x133), region = 40  ;;  %s378_s30 = sshll.u32 (!%p190_p9), %s213_s26, 3 }
   0xf   : > { %s383_s6 = sshll.u32 (!%p190_p9), %s544_s22, 3  ;;  %s215_s12 = scalar_lea.vmem (!%p190_p9), [#allocation2], %s378_s30 }
  0x10   : > { %s310_s9 = scalar_lea.hbm (!%p190_p9), %s657_s5, %s383_s6  ;;  %s312_s13 = sshll.u32 (!%p190_p9), %s215_s12, 4  ;;  %s313_s13 = int_to_ptr.vmem [resolvable:$true] %s312_s13 }
  0x11   : > { %s300_s15 = scalar_lea.sflag (!%p190_p9), [#allocation3], %s213_s26  ;;  %s449_s25 = scalar_lea.hbm (!%p190_p9), %s657_s5, 16 }
  0x13   : > { %v224_v0 = vld [vmem:[%s653_s1 + $0x18] sm:$0xff]  ;;  %v223_v1 = vld [vmem:[%s653_s1 + $0x10] sm:$0xff]  ;;  %v222_v2 = vld [vmem:[%s653_s1 + $0x8] sm:$0xff]  ;;  %s217_s11 = scalar_select %p216_p10, %s544_s22, 1  ;;  %vm229_vm0 = vcmask 261120   ;;  %vm274_vm1 = vcmask 523264  }
  0x14   : > { %245 = vmatpush.msra.mxu0 %v224_v0  ;;  %v221_v3 = vld [vmem:[%s653_s1] sm:$0xff]  ;;  %v269_v5 = vld [vmem:[%s655_s3 + $0x38] sm:$0xff]  ;;  %v268_v6 = vld [vmem:[%s655_s3 + $0x30] sm:$0xff] }
  0x15   : > { %s379_s14 = sshll.u32 %s217_s11, 3  ;;  %286 = vmatpush.msra.mxu1 %v269_v5  ;;  %v267_v7 = vld [vmem:[%s655_s3 + $0x28] sm:$0xff]  ;;  %v266_v8 = vld [vmem:[%s655_s3 + $0x20] sm:$0xff]  ;;  %v265_v9 = vld [vmem:[%s655_s3 + $0x18] sm:$0xff] }
  0x16   : > { %246 = vmatpush.msra.mxu0 %v223_v1  ;;  %s219_s17 = scalar_lea.vmem %s652_s0, %s379_s14  ;;  %v264_v10 = vld [vmem:[%s655_s3 + $0x10] sm:$0xff]  ;;  %v263_v11 = vld [vmem:[%s655_s3 + $0x8] sm:$0xff]  ;;  %v262_v12 = vld [vmem:[%s655_s3] sm:$0xff]  ;;  %s314_s14 = sshll.u32 %s310_s9, 4  ;;  %s315_s14 = int_to_ptr.hbm [resolvable:$true] %s314_s14 }
  0x17   : > { %v220_v4 = vld [vmem:[%s219_s17] sm:$0xff]  ;;  %287 = vmatpush.msra.mxu1 %v268_v6  ;;  %s443_s22 = sshra.s32 %s315_s14, 4  ;;  %s444_s22 = int_to_ptr.hbm [resolvable:$true] %s443_s22 }
  0x18   : > { %247 = vmatpush.msra.mxu0 %v222_v2  ;;  %v425_v13 = vld [vmem:[%s654_s2] ss:$0 sm:$0xff]  ;;  %s445_s16 = scalar_lea.hbm %s444_s22, 8  ;;  %p450_p0 = scmp.lt.s32.totalorder %s444_s22, %s657_s5 }
  0x19   : > { %288 = vmatpush.msra.mxu1 %v267_v7  ;;  %v426_v25 = vld [vmem:[%s656_s4] ss:$0 sm:$0xff]  ;;  %p446_p11 = scmp.ne.s32.totalorder %s444_s22, %s445_s16  ;;  %p451_p1 = scmp.lt.s32.totalorder %s449_s25, %s445_s16 }
  0x1a   : > { %248 = vmatpush.msra.mxu0 %v221_v3 }
  0x1b   : > { %380 = vmatmul.msk.f32.vlgmr.msra.gmra.mxu0 %vm229_vm0, %v220_v4  ;;  %289 = vmatpush.msra.mxu1 %v266_v8  ;;  %p447_p12 = pnand %p446_p11, %p561_p5  ;;  %p452_p2 = por %p451_p1, %p450_p0 }
  0x1d   : > { %290 = vmatpush.msra.mxu1 %v265_v9  ;;  %p448_p13 = pneg %p447_p12 }
  0x1f   : > { %291 = vmatpush.msra.mxu1 %v264_v10  ;;  %p453_p3 = pnand %p452_p2, %p448_p13 }
  0x21   : > { %292 = vmatpush.msra.mxu1 %v263_v11 }
  0x23   : > { %293 = vmatpush.msra.mxu1 %v262_v12 }
  0x98   : > { %v250_v14 = vpop.f32.mrf.mxu0 }
  0x99   : > { %v251_v15 = vadd.f32 %v425_v13, %v250_v14 }
  0x9b   : > { %v254_v16 = vmul.f32 0.044715, %v251_v15  ;;  %v253_v22 = vmul.f32 0.5, %v251_v15 }
  0x9d   : > { %v255_v17 = vmul.f32 %v254_v16, %v251_v15 }
  0x9f   : > { %v256_v18 = vmul.f32 %v255_v17, %v251_v15 }
  0xa1   : > { %v257_v19 = vadd.f32 %v256_v18, %v251_v15 }
  0xa3   : > { %v258_v20 = vmul.f32 0.7978846, %v257_v19 }
  0xa5   : > { %427 = vtanh.f32 %v258_v20 }
  0xab   : > { %v428_v21 = vpop.eup %427 }
  0xac   : > { %v260_v23 = vadd.f32 1.0, %v428_v21 }
  0xae   : > { %v261_v24 = vmul.f32 %v260_v23, %v253_v22 }
  0xb0   : > { %381 = vmatmul.msk.f32.vlgmr.msra.gmra.mxu1 %vm274_vm1, %v261_v24 }
 0x12d   : > { %v295_v26 = vpop.f32.mrf.mxu1 }
 0x12e   : > { %v296_v27 = vadd.f32 %v426_v25, %v295_v26 }
 0x130   : > { %298 = vst.msk [vmem:[%s215_s12] sm:$0xff] %vm229_vm0, %v296_v27 }
 0x131   : > { %456 = shalt.err (!%p453_p3)
}
 0x132   : > { %386 = dma.vmem_to_hbm [thread:$0]  (%p561_p5), %s313_s13, 128, %s315_s14, %s300_s15  }
 0x133 PF: > { %p392_p4 = scmp.ge.s32.totalorder %s491_s21, 2  ;;  %s326_s26 = sand.u32 1, %s479_s18  }
 0x134   : > { %s327_s7 = scalar_lea.sflag [#allocation3], %s326_s26 }
 0x135   : > { %p389_p7 = pnand %p392_p4, %p565_p6 }
 0x137   : > { %p390_p8 = pneg %p389_p7 }
 0x139   : > { %474 = dma.done.wait (%p390_p8), %s327_s7, 128  }
 0x13a   : > { %476 = vsyncadd (%p390_p8), %s327_s7, 4294967168  ;;  %p15_p9 = scmp.ge.s32.totalorder %s548_s24, 4   ;;  %s660_s18 = smov %s483_s19 }
 0x13b   : > { %s661_s19 = smov %s487_s20  ;;  %s662_s20 = smov %s559_s27 }
 0x13c   : > { %s663_s21 = smov %s548_s24  ;;  %17 = sbr.rel (!%p15_p9) target bundleno = 3 (0x3), region = 75 }
 0x141   :  { %333 = vsyncpa [#allocation3], 1 }
 0x142   :  { %335 = vsyncpa [#allocation3 + $0x1], 1 }

</bundles_post_ra>
